<compile_context>
chip_gen: v6e
topology: v6e:2x2x1
jax: 0.10.0
libtpu: 0.0.40
codegen_flags: <defaults>
</compile_context>

<pallas_src>
import jax
import jax.numpy as jnp
from jax.experimental import pallas as pl
from jax.experimental.pallas import tpu as pltpu

LANE = 128


def _round_up(x, m):
    return (x + m - 1) // m * m


def _patch_embed_kernel(x_ref, w_ref, b_ref, o_ref):
    # x_ref: (TM, K) patch tile, w_ref: (K, Dp) VMEM-resident weight,
    # b_ref: (1, Dp) f32 bias, o_ref: (TM, Dp) output tile.
    acc = jnp.dot(x_ref[...], w_ref[...], preferred_element_type=jnp.float32)
    o_ref[...] = (acc + b_ref[...]).astype(o_ref.dtype)


def _choose_tile_m(M, K, Dp, in_bytes, out_bytes,
                   vmem_budget_bytes=16 * 1024 * 1024):
    # Resident weight + bias (single-buffered, constant index_map).
    fixed = K * Dp * in_bytes + Dp * 4
    avail = max(vmem_budget_bytes - fixed, 0)
    # Double-buffered x tile + double-buffered output tile.
    per_row = 2 * K * in_bytes + 2 * Dp * out_bytes
    tm = avail // max(per_row, 1)
    tm = int(max(16, min(tm, 1024, M)))
    return max(16, (tm // 16) * 16)


def patch_embed(x, weight, bias, patch_size, *,
                compute_dtype=jnp.bfloat16, tile_m=None):
    """
    x:      [B, C, H, W]   (NCHW, like PyTorch)
    weight: [D, C, ph, pw] (PyTorch Conv2d weight layout)
    bias:   [D]
    returns [B, Pn, D] with Pn = (H//ph)*(W//pw)
    """
    B, C, H, W = x.shape
    D = weight.shape[0]
    ph, pw = patch_size
    Hp, Wp = H // ph, W // pw
    Pn = Hp * Wp
    K = C * ph * pw
    M = B * Pn
    out_dtype = x.dtype

    # --- glue: rearrange NCHW into patch matrix [B*Pn, C*ph*pw] ---
    # Cast to the (narrower) compute dtype first so the relayout pass moves
    # half the HBM bytes when compute_dtype is bf16.
    # TODO(synk): fuse this NCHW->patch-matrix relayout into the kernel DMA
    # (memory_space=pl.ANY + manual copies) to remove the extra HBM round trip.
    xc = x.astype(compute_dtype)
    xp = xc.reshape(B, C, Hp, ph, Wp, pw)
    xp = jnp.transpose(xp, (0, 2, 4, 1, 3, 5)).reshape(M, K)

    # Conv weight [D, C, ph, pw] -> matmul weight [K, D]; bias stays f32.
    w2 = weight.reshape(D, K).T.astype(compute_dtype)
    b2 = bias.astype(jnp.float32).reshape(1, D)

    # Lane-dense output: pad D up to a multiple of 128 (no-op for ViT D>=768).
    Dp = _round_up(D, LANE)
    if Dp != D:
        w2 = jnp.pad(w2, ((0, 0), (0, Dp - D)))
        b2 = jnp.pad(b2, ((0, 0), (0, Dp - D)))

    in_bytes = jnp.dtype(compute_dtype).itemsize
    out_bytes = jnp.dtype(out_dtype).itemsize
    if tile_m is None:
        tile_m = _choose_tile_m(M, K, Dp, in_bytes, out_bytes)
    tile_m = max(16, (int(tile_m) // 16) * 16)

    # Pad M to a whole number of tiles (zero rows are sliced off afterwards).
    Mp = _round_up(M, tile_m)
    if Mp != M:
        xp = jnp.pad(xp, ((0, Mp - M), (0, 0)))

    cost = pl.CostEstimate(
        flops=2 * M * K * D,
        transcendentals=0,
        bytes_accessed=M * K * in_bytes + K * Dp * in_bytes + M * Dp * out_bytes,
    )

    out = pl.pallas_call(
        _patch_embed_kernel,
        out_shape=jax.ShapeDtypeStruct((Mp, Dp), out_dtype),
        grid_spec=pltpu.PrefetchScalarGridSpec(
            num_scalar_prefetch=0,
            grid=(Mp // tile_m,),
            in_specs=[
                pl.BlockSpec((tile_m, K), lambda i: (i, 0)),   # x tile, pipelined
                pl.BlockSpec((K, Dp), lambda i: (0, 0)),       # weight, resident
                pl.BlockSpec((1, Dp), lambda i: (0, 0)),       # bias, resident
            ],
            out_specs=pl.BlockSpec((tile_m, Dp), lambda i: (i, 0)),
        ),
        compiler_params=pltpu.CompilerParams(
            dimension_semantics=("parallel",),
            vmem_limit_bytes=32 * 1024 * 1024,
        ),
        cost_estimate=cost,
    )(xp, w2, b2)

    return out[:M, :D].reshape(B, Pn, D)


if __name__ == "__main__":
    # Small shapes consistent with the module: img 16x16, patch 4, C=4, D=32
    B, C, H, W = 2, 4, 16, 16
    patch = (4, 4)
    D = 32

    key = jax.random.PRNGKey(0)
    kx, kw, kb = jax.random.split(key, 3)
    x = jax.random.normal(kx, (B, C, H, W), dtype=jnp.float32)
    weight = jax.random.normal(kw, (D, C, patch[0], patch[1]), dtype=jnp.float32) * 0.02
    bias = jax.random.normal(kb, (D,), dtype=jnp.float32) * 0.02

    Pn = (H // patch[0]) * (W // patch[1])

    # Plain-JAX reference (lax conv equivalent of the PyTorch module).
    ref = jax.lax.conv_general_dilated(
        x, weight, window_strides=patch, padding="VALID",
        dimension_numbers=("NCHW", "OIHW", "NCHW"),
    ) + bias.reshape(1, D, 1, 1)
    ref = ref.reshape(B, D, -1).transpose(0, 2, 1)

    # 1) f32 compute path: tight check (tile_m=16 -> 2 grid steps, exercises
    #    the pipelined/tiled path and resident weight/bias).
    out_f32 = patch_embed(x, weight, bias, patch,
                          compute_dtype=jnp.float32, tile_m=16)
    out_f32 = jax.block_until_ready(out_f32)
    assert out_f32.shape == (B, Pn, D)
    assert jnp.allclose(out_f32, ref, atol=1e-4, rtol=1e-4)

    # 2) Default bf16 MXU path (f32 accumulation, f32 bias/output): looser tol.
    out_bf16 = patch_embed(x, weight, bias, patch, tile_m=16)
    out_bf16 = jax.block_until_ready(out_bf16)
    assert out_bf16.shape == (B, Pn, D)
    assert jnp.allclose(out_bf16, ref, atol=3e-2, rtol=3e-2)

    print("KERNEL_OK")
</pallas_src>

<mosaic_0001>
module attributes {stable_mosaic.version = 11 : i64} {
  func.func @_patch_embed_kernel(%arg0: i32, %arg1: memref<16x64xf32, #tpu.memory_space<vmem>>, %arg2: memref<64x128xf32, #tpu.memory_space<vmem>>, %arg3: memref<1x128xf32, #tpu.memory_space<vmem>>, %arg4: memref<16x128xf32, #tpu.memory_space<vmem>>) attributes {dimension_semantics = [#tpu.dimension_semantics<parallel>], iteration_bounds = array<i64: 2>, scalar_prefetch = 0 : i64, scratch_operands = 0 : i64, tpu.core_type = #tpu.core_type<tc>, window_params = [{transform_indices = @transform_0, window_bounds = array<i64: 16, 64>}, {pipeline_mode = #tpu.pipeline_mode<synchronous>, transform_indices = @transform_1, window_bounds = array<i64: 64, 128>}, {pipeline_mode = #tpu.pipeline_mode<synchronous>, transform_indices = @transform_2, window_bounds = array<i64: 1, 128>}, {transform_indices = @transform_3, window_bounds = array<i64: 16, 128>}]} {
    %c0 = arith.constant 0 : index
    %c0_0 = arith.constant 0 : index
    %0 = vector.load %arg1[%c0, %c0_0] : memref<16x64xf32, #tpu.memory_space<vmem>>, vector<16x64xf32>
    %c0_1 = arith.constant 0 : index
    %c0_2 = arith.constant 0 : index
    %1 = vector.load %arg2[%c0_1, %c0_2] : memref<64x128xf32, #tpu.memory_space<vmem>>, vector<64x128xf32>
    %cst = arith.constant dense<0.000000e+00> : vector<16x128xf32>
    %2 = tpu.matmul %0, %1, %cst {dimension_numbers = #tpu.dot_dimension_numbers<[1], [0], [0], [1], [0, 0, 1, 1], [], []>} : vector<16x64xf32>, vector<64x128xf32>, vector<16x128xf32> -> vector<16x128xf32>
    %c0_3 = arith.constant 0 : index
    %c0_4 = arith.constant 0 : index
    %3 = vector.load %arg3[%c0_3, %c0_4] : memref<1x128xf32, #tpu.memory_space<vmem>>, vector<1x128xf32>
    %4 = vector.broadcast %3 : vector<1x128xf32> to vector<16x128xf32>
    %5 = arith.addf %2, %4 : vector<16x128xf32>
    %c0_5 = arith.constant 0 : index
    %c0_6 = arith.constant 0 : index
    %6 = vector.load %arg4[%c0_5, %c0_6] : memref<16x128xf32, #tpu.memory_space<vmem>>, vector<16x128xf32>
    tpu.vector_store %arg4[%c0_5, %c0_6], %5 {strides = array<i32>} : memref<16x128xf32, #tpu.memory_space<vmem>>, vector<16x128xf32>,
    return
  }
  func.func @transform_0(%arg0: i32) -> (i32, i32) {
    %c0_i32 = arith.constant 0 : i32
    %c0_i32_0 = arith.constant 0 : i32
    return %arg0, %c0_i32 : i32, i32
  }
  func.func @transform_1(%arg0: i32) -> (i32, i32) {
    %c0_i32 = arith.constant 0 : i32
    %c0_i32_0 = arith.constant 0 : i32
    %c0_i32_1 = arith.constant 0 : i32
    return %c0_i32, %c0_i32_0 : i32, i32
  }
  func.func @transform_2(%arg0: i32) -> (i32, i32) {
    %c0_i32 = arith.constant 0 : i32
    %c0_i32_0 = arith.constant 0 : i32
    %c0_i32_1 = arith.constant 0 : i32
    return %c0_i32, %c0_i32_0 : i32, i32
  }
  func.func @transform_3(%arg0: i32) -> (i32, i32) {
    %c0_i32 = arith.constant 0 : i32
    %c0_i32_0 = arith.constant 0 : i32
    return %arg0, %c0_i32 : i32, i32
  }
}

</mosaic_0001>

<bundles_post_ra>
// kernel: tpu_custom_call.1
= control target key start
LH: loop header
LB: loop body
LE: loop exit
PB: predicated region body
PF: predicated region fallthrough
CT: control target
= control target key end

     0   :  { %8 = vsyncpa [#allocation3], 0  ;;  %s858_s0 = inlined_call_operand.hbm [shape: f32[32,64], index: 0, kind: input, shape index: {}]   ;;  %s859_s1 = inlined_call_operand.hbm [shape: f32[64,128], index: 1, kind: input, shape index: {}]   ;;  %s860_s2 = inlined_call_operand.vmem [shape: f32[1,128], index: 2, kind: input, shape index: {}]   ;;  %s861_s3 = inlined_call_operand.hbm [shape: f32[32,128], index: 3, kind: output, shape index: {}]  }
   0x1   :  { %10 = vsyncpa [#allocation3 + $0x1], 0 }
   0x2   :  { %11 = vsyncpa [#allocation6], 0 }
   0x3   :  { %12 = vsyncpa [#allocation4], 0 }
   0x4   :  { %14 = vsyncpa [#allocation4 + $0x1], 0  ;;  %s666_s12 = smov 0   ;;  %s668_s13 = smov 0  }
   0x5   :  { %s670_s14 = smov 0   ;;  %s672_s15 = smov 0  }
   0x6 LB: > { %s687_s16 = sadd.s32 4294967295, %s637_s15   ;;  %s404_s17 = sadd.s32 4294967294, %s637_s15   ;;  %s637_s15 = sphi %s672_s15, %s883_s15   ;;  %s633_s14 = sphi %s670_s14, %s882_s14   ;;  %s629_s13 = sphi %s668_s13, %s881_s13   ;;  %s625_s12 = sphi %s666_s12, %s880_s12  }
   0x7   : > { %p40_p0 = scmp.ne.s32.totalorder %s629_s13, %s625_s12  ;;  %p862_p1 = scmp.eq.s32.totalorder %s687_s16, 0 }
   0x8   : > { %p112_p3 = scmp.eq.s32.totalorder %s404_s17, 1  ;;  %p405_p5 = scmp.ge.s32.totalorder %s637_s15, 1 }
   0x9   : > { %p696_p4 = por %p862_p1, %p40_p0  ;;  %p119_p7 = scmp.lt.s32.totalorder %s637_s15, 3 }
   0xa   : > { %p701_p6 = por %p112_p3, %p40_p0  ;;  %s639_s21 = smov [#allocation5]  }
   0xb   : > { %s866_s18 = scalar_select %p696_p4, 1, 0 }
   0xc   : > { %s867_s19 = scalar_select %p701_p6, 1, 0 }
   0xd   : > { %p706_p8 = pnand %p405_p5, %p119_p7  ;;  %s131_s22 = sshll.u32 %s639_s21, 4  ;;  %s132_s22 = int_to_ptr.vmem [resolvable:$true] %s131_s22 }
   0xe   : > { %s720_s24 = sadd.s32 1, %s637_s15   ;;  %s27_s25 = sadd.s32 1, %s633_s14 }
   0xf   : > { %s868_s20 = scalar_select %p706_p8, 1, 0 }
  0x10   : > { %p462_p9 = pneg %p706_p8  ;;  %s24_s26 = ssub.s32 %s637_s15, %s720_s24 }
  0x11   : > { %s526_s27 = scalar_lea.vmem %s132_s22, 1024  ;;  %p534_p5 = scmp.lt.s32.totalorder %s132_s22, %s132_s22 }
  0x12   : > { %p715_p11 = pnand %p462_p9, %p862_p1  ;;  %p527_p13 = scmp.ne.s32.totalorder %s132_s22, %s526_s27 }
  0x13   : > { %p535_p7 = scmp.lt.s32.totalorder %s526_s27, %s526_s27 }
  0x14   : > { %p517_p12 = pneg %p715_p11 }
  0x15   : > { %p536_p10 = por %p535_p7, %p534_p5 }
  0x16   : > { %p529_p0 = pnand %p527_p13, %p517_p12 }
  0x18   : > { %p530_p3 = pneg %p529_p0 }
  0x1a   : > { %p537_p2 = pnand %p536_p10, %p530_p3 }
  0x1c   : > { %540 = shalt.err (!%p537_p2)
}
  0x1d   : > { %s640_s28 = smov 128   ;;  %s641_s29 = smov 8  }
  0x1e   : > { %465 = dma.hbm_to_vmem [thread:$0]  (!%p715_p11), %s859_s1, 1024, %s132_s22, [#allocation6], %s640_s28, %s640_s28, %s641_s29  }
  0x1f   : > { %p25_p2 = scmp.eq.s32.totalorder %s24_s26, 0  ;;  %p34_p9 = scmp.ne.s32.totalorder %s633_s14, %s629_s13 }
  0x20   : > { %p35_p10 = scmp.eq.s32.totalorder %s637_s15, 0  ;;  %p475_p12 = scmp.lt.s32.totalorder %s637_s15, 2 }
  0x21   : > { %s740_s5 = scalar_select %p25_p2, %s633_s14, %s27_s25  }
  0x22   : > { %p36_p13 = por %p35_p10, %p34_p9  ;;  %p870_p0 = scmp.eq.s32.totalorder %s687_s16, 1 }
  0x23   : > { %s148_s7 = sand.u32 1, %s633_s14   ;;  %s423_s8 = sshll.u32 %s637_s15, 8 }
  0x24   : > { %p744_p3 = por %p870_p0, %p34_p9  ;;  %s408_s9 = sshll.u32 %s148_s7, 4 }
  0x25   : > { %s753_s17 = scalar_lea.hbm %s858_s0, %s423_s8  ;;  %s152_s21 = scalar_lea.vmem [#allocation2], %s408_s9 }
  0x26   : > { %s871_s6 = scalar_select %p744_p3, 1, 0 }
  0x27   : > { %s159_s22 = sshll.u32 %s152_s21, 4  ;;  %p755_p11 = pnand %p475_p12, %p36_p13  ;;  %s759_s22 = int_to_ptr.vmem [resolvable:$true] %s159_s22 }
  0x28   : > { %s761_s25 = scalar_lea.sflag [#allocation3], %s148_s7  ;;  %s541_s26 = scalar_lea.hbm %s753_s17, 256 }
  0x29   : > { %p542_p5 = scmp.ne.s32.totalorder %s753_s17, %s541_s26  ;;  %p543_p7 = pneg %p755_p11 }
  0x2a   : > { %s546_s4 = scalar_lea.hbm %s858_s0, 512  ;;  %p547_p10 = scmp.lt.s32.totalorder %s753_s17, %s858_s0 }
  0x2b   : > { %p544_p2 = pnand %p543_p7, %p542_p5  ;;  %p548_p12 = scmp.lt.s32.totalorder %s546_s4, %s541_s26 }
  0x2d   : > { %p545_p9 = pneg %p544_p2  ;;  %p549_p13 = por %p548_p12, %p547_p10 }
  0x2f   : > { %p550_p0 = pnand %p549_p13, %p545_p9 }
  0x31   : > { %553 = shalt.err (!%p550_p0)
}
  0x32   : > { %s554_s7 = scalar_lea.vmem %s759_s22, 256  ;;  %s642_s10 = smov [#allocation2]  }
  0x33   : > { %p555_p1 = scmp.ne.s32.totalorder %s759_s22, %s554_s7  ;;  %s559_s11 = sshll.u32 %s642_s10, 4  ;;  %s560_s11 = int_to_ptr.vmem [resolvable:$false] %s559_s11 }
  0x34   : > { %s561_s21 = scalar_lea.vmem %s560_s11, 512  ;;  %p562_p2 = scmp.lt.s32.totalorder %s759_s22, %s560_s11 }
  0x35   : > { %p557_p6 = pnand %p555_p1, %p543_p7  ;;  %p563_p3 = scmp.lt.s32.totalorder %s561_s21, %s554_s7 }
  0x37   : > { %p558_p5 = pneg %p557_p6  ;;  %p564_p4 = por %p563_p3, %p562_p2 }
  0x39   : > { %p565_p8 = pnand %p564_p4, %p558_p5 }
  0x3b   : > { %568 = shalt.err (!%p565_p8)
}
  0x3c   : > { %469 = dma.hbm_to_vmem [thread:$0]  (!%p755_p11), %s753_s17, 256, %s759_s22, %s761_s25, %s640_s28, %s640_s28, %s641_s29  }
  0x3d   : > { %p873_p1 = scmp.ne.s32.totalorder %s868_s20, 0 }
  0x3e   : > { %s788_s26 = sand.u32 (!%p873_p1), 1, %s629_s13   ;;  %p874_p4 = scmp.ne.s32.totalorder (!%p873_p1), %s866_s18, 0 }
  0x3f   : > { %171 = sbr.rel (%p873_p1) target bundleno = 300 (0x12c), region = 32  ;;  %s412_s27 = sshll.u32 (!%p873_p1), %s788_s26, 4 }
  0x40   : > { %s174_s30 = scalar_lea.sflag (!%p873_p1), [#allocation3], %s788_s26  ;;  %s177_s23 = scalar_lea.vmem (!%p873_p1), [#allocation2], %s412_s27 }
  0x44   : > { %612 = dma.done.wait (%p874_p4), %s174_s30, 256  }
  0x45   : > { %614 = vsyncadd (%p874_p4), %s174_s30, 4294967040  ;;  %p875_p6 = scmp.eq.s32.totalorder %s687_s16, 0 }
  0x47   : > { %616 = dma.done.wait (%p875_p6), [#allocation6], 1024   ;;  %p876_p8 = pmov %p875_p6 }
  0x48   : > { %v215_v0 = vld [vmem:[#allocation5 + $0x38] sm:$0xff]  ;;  %v214_v1 = vld [vmem:[#allocation5 + $0x30] sm:$0xff]  ;;  %vm223_vm0 = vcmask 523264   ;;  %v213_v2 = vld [vmem:[#allocation5 + $0x28] sm:$0xff]  ;;  %s203_s28 = scalar_lea.vmem [#allocation7], %s412_s27  ;;  %s424_s17 = sshll.u32 %s687_s16, 8 }
  0x49   : > { %618 = vsyncadd (%p876_p8), [#allocation6], 4294966272  ;;  %435 = vmatprep.subr.mxu0 %v215_v0  ;;  %v206_v3 = vld [vmem:[%s177_s23] sm:$0xff]  ;;  %v211_v5 = vld [vmem:[#allocation5 + $0x18] sm:$0xff]  ;;  %s321_s29 = sshll.u32 %s203_s28, 4  ;;  %s815_s4 = scalar_lea.hbm %s861_s3, %s424_s17  ;;  %s810_s29 = int_to_ptr.vmem [resolvable:$true] %s321_s29 }
  0x4a   : > { %436 = vmatpush3.msra.mxu0 %v215_v0  ;;  %451 = vmatprep.mubr.msk.f32.mxu0 %vm223_vm0, %v206_v3  ;;  %v212_v4 = vld [vmem:[#allocation5 + $0x20] sm:$0xff]  ;;  %v210_v6 = vld [vmem:[#allocation5 + $0x10] sm:$0xff]  ;;  %v209_v7 = vld [vmem:[#allocation5 + $0x8] sm:$0xff]  ;;  %s308_s8 = scalar_lea.sflag [#allocation4], %s788_s26  ;;  %s569_s9 = scalar_lea.vmem %s810_s29, 256 }
  0x4b   : > { %437 = vmatprep.subr.mxu0 %v214_v1  ;;  %v208_v8 = vld [vmem:[#allocation5] sm:$0xff]  ;;  %v207_v9 = vld [vmem:[%s177_s23 + $0x8] sm:$0xff]  ;;  %p570_p3 = scmp.ne.s32.totalorder %s810_s29, %s569_s9  ;;  %p877_p11 = scmp.ne.s32.totalorder %s871_s6, 0 }
  0x4c   : > { %438 = vmatpush3.msra.mxu0 %v214_v1  ;;  %v415_v10 = vld [vmem:[%s860_s2] ss:$0 sm:$0xff]  ;;  %s643_s16 = smov [#allocation7]  }
  0x4d   : > { %439 = vmatprep.subr.mxu0 %v213_v2  ;;  %p571_p7 = pnand %p570_p3, %p877_p11  ;;  %s573_s7 = sshll.u32 %s643_s16, 4  ;;  %s574_s7 = int_to_ptr.vmem [resolvable:$false] %s573_s7 }
  0x4e   : > { %440 = vmatpush3.msra.mxu0 %v213_v2  ;;  %s575_s10 = scalar_lea.vmem %s574_s7, 512  ;;  %p576_p10 = scmp.lt.s32.totalorder %s810_s29, %s574_s7 }
  0x4f   : > { %441 = vmatprep.subr.mxu0 %v212_v4  ;;  %p572_p9 = pneg %p571_p7  ;;  %p577_p12 = scmp.lt.s32.totalorder %s575_s10, %s569_s9 }
  0x50   : > { %442 = vmatpush3.msra.mxu0 %v212_v4 }
  0x51   : > { %443 = vmatprep.subr.mxu0 %v211_v5  ;;  %p578_p13 = por %p577_p12, %p576_p10 }
  0x52   : > { %444 = vmatpush3.msra.mxu0 %v211_v5 }
  0x53   : > { %445 = vmatprep.subr.mxu0 %v210_v6  ;;  %p579_p0 = pnand %p578_p13, %p572_p9 }
  0x54   : > { %446 = vmatpush3.msra.mxu0 %v210_v6 }
  0x55   : > { %447 = vmatprep.subr.mxu0 %v209_v7 }
  0x56   : > { %448 = vmatpush3.msra.mxu0 %v209_v7 }
  0x57   : > { %449 = vmatprep.subr.mxu0 %v208_v8 }
  0x58   : > { %450 = vmatpush3.msra.mxu0 %v208_v8 }
  0x59   : > { %452 = vmatmul.mubr.msk.f32.vlgmr.msra.gmra.mxu0 %vm223_vm0, %v207_v9 }
 0x119   : > { %v453_v11 = vpop.f32.mrf.mxu0 }
 0x11a   : > { %v302_v12 = vadd.f32 %v453_v11, %v415_v10 }
 0x11b   : > { %v296_v13 = vpop.f32.mrf.mxu0 }
 0x11c   : > { %306 = vst [vmem:[%s203_s28 + $0x8] sm:$0xff] %v302_v12  ;;  %v297_v14 = vadd.f32 %v415_v10, %v296_v13 }
 0x11e   : > { %305 = vst [vmem:[%s203_s28] sm:$0xff] %v297_v14 }
 0x11f   : > { %582 = shalt.err (!%p579_p0)
}
 0x120   : > { %s583_s11 = scalar_lea.hbm %s815_s4, 256  ;;  %s587_s30 = scalar_lea.hbm %s861_s3, 512 }
 0x121   : > { %p584_p5 = scmp.ne.s32.totalorder %s815_s4, %s583_s11  ;;  %p588_p4 = scmp.lt.s32.totalorder %s815_s4, %s861_s3 }
 0x122   : > { %p589_p6 = scmp.lt.s32.totalorder %s587_s30, %s583_s11 }
 0x123   : > { %p585_p2 = pnand %p584_p5, %p877_p11 }
 0x124   : > { %p590_p8 = por %p589_p6, %p588_p4 }
 0x125   : > { %p586_p1 = pneg %p585_p2 }
 0x127   : > { %p591_p3 = pnand %p590_p8, %p586_p1 }
 0x129   : > { %594 = shalt.err (!%p591_p3)
}
 0x12a   : > { %s644_s20 = smov 128   ;;  %s645_s28 = smov 8  }
 0x12b   : > { %460 = dma.vmem_to_hbm [thread:$0]  (%p877_p11), %s810_s29, 256, %s815_s4, %s308_s8, %s644_s20, %s644_s20, %s645_s28  }
 0x12c PF: > { %s336_s17 = sand.u32 1, %s625_s12   ;;  %p878_p7 = scmp.ne.s32.totalorder %s867_s19, 0 }
 0x12d   : > { %p879_p9 = scmp.ge.s32.totalorder %s637_s15, 2  ;;  %s337_s22 = scalar_lea.sflag [#allocation4], %s336_s17 }
 0x12f   : > { %p471_p10 = pnand %p879_p9, %p878_p7 }
 0x131   : > { %p472_p12 = pneg %p471_p10 }
 0x133   : > { %620 = dma.done.wait (%p472_p12), %s337_s22, 256  }
 0x134   : > { %622 = vsyncadd (%p472_p12), %s337_s22, 4294967040  ;;  %p17_p13 = scmp.ge.s32.totalorder %s720_s24, 4   ;;  %s880_s12 = smov %s629_s13 }
 0x135   : > { %s881_s13 = smov %s633_s14  ;;  %s882_s14 = smov %s740_s5 }
 0x136   : > { %s883_s15 = smov %s720_s24  ;;  %19 = sbr.rel (!%p17_p13) target bundleno = 6 (0x6), region = 81 }
 0x13b   :  { %342 = vsyncpa [#allocation3], 1 }
 0x13c   :  { %344 = vsyncpa [#allocation3 + $0x1], 1 }
 0x13d   :  { %345 = vsyncpa [#allocation6], 1 }
 0x13e   :  { %346 = vsyncpa [#allocation4], 1 }
 0x13f   :  { %348 = vsyncpa [#allocation4 + $0x1], 1 }

</bundles_post_ra>
